<compile_context>
chip_gen: v5e
topology: v5e:2x2
jax: 0.10.0
libtpu: 0.0.40
codegen_flags: <defaults>
</compile_context>

<pallas_src>
import jax
import jax.numpy as jnp
from jax.experimental import pallas as pl
from jax.experimental.pallas import tpu as pltpu

# ---------------------------------------------------------------------------
# Model dimensions (small, consistent with the example spec in the module)
# ---------------------------------------------------------------------------
IN_DIMS = [4, 6]          # one state input per environment
HEAD_HID = [32, 32]       # [[32],[32]] -> one hidden layer of 32 per head
BODY_HID = 64             # [64] body
OUT_DIMS = [3, 5]         # one action output per environment (tails = Linear)
BATCH = 8

IN_TOTAL = sum(IN_DIMS)       # 10
HEAD_TOTAL = sum(HEAD_HID)    # 64  (== concat of head outputs == body input)
OUT_TOTAL = sum(OUT_DIMS)     # 8
SLAB_COLS = max(HEAD_TOTAL, BODY_HID, OUT_TOTAL)   # 64


def _round_up(n, m):
    return ((n + m - 1) // m) * m


# --- static, sublane-aligned (multiple-of-8) row offsets in the param slab --
_R_W1A = 0                               # head-0 weight  [in0, 64] (cols 0:32)
_R_W1B = _round_up(_R_W1A + IN_DIMS[0], 8)   # 8:  head-1 weight [in1, 64] (cols 32:64)
_R_B1 = _round_up(_R_W1B + IN_DIMS[1], 8)    # 16: head bias row [1, 64]
_R_W2 = _round_up(_R_B1 + 1, 8)              # 24: body weight   [64, 64]
_R_B2 = _round_up(_R_W2 + HEAD_TOTAL, 8)     # 88: body bias row [1, 64]
_R_W3 = _round_up(_R_B2 + 1, 8)              # 96: fused tail weight [64, 8]
_R_B3 = _round_up(_R_W3 + BODY_HID, 8)       # 160: fused tail bias row [1, 8]
SLAB_ROWS = _round_up(_R_B3 + 1, 8)          # 168

# batch tile for large batches (keeps double-buffered blocks ~2.5 MiB VMEM)
TB_MAX = 512


# ---------------------------------------------------------------------------
# Pallas kernel: fused forward pass  (heads -> body -> tails), 4 MXU dots
# ---------------------------------------------------------------------------
def hydra_mlp_kernel(x0_ref, x1_ref, p_ref, out0_ref, out1_ref):
    x0 = x0_ref[...]                                   # [TB, in0]
    x1 = x1_ref[...]                                   # [TB, in1]

    # Static, sublane-aligned slices of the single resident VMEM param slab.
    w1a = p_ref[_R_W1A:_R_W1A + IN_DIMS[0], :HEAD_TOTAL]   # [in0, 64]
    w1b = p_ref[_R_W1B:_R_W1B + IN_DIMS[1], :HEAD_TOTAL]   # [in1, 64]
    b1 = p_ref[_R_B1:_R_B1 + 1, :HEAD_TOTAL]               # [1, 64]
    w2 = p_ref[_R_W2:_R_W2 + HEAD_TOTAL, :BODY_HID]        # [64, 64]
    b2 = p_ref[_R_B2:_R_B2 + 1, :BODY_HID]                 # [1, 64]
    w3 = p_ref[_R_W3:_R_W3 + BODY_HID, :OUT_TOTAL]         # [64, 8]
    b3 = p_ref[_R_B3:_R_B3 + 1, :OUT_TOTAL]                # [1, 8]

    # Heads: two small-K dots summed == the block-diagonal head matmul.
    # (w1a has head-0 weights in cols 0:32, w1b has head-1 weights in 32:64.)
    h = (jnp.dot(x0, w1a, preferred_element_type=jnp.float32)
         + jnp.dot(x1, w1b, preferred_element_type=jnp.float32)
         + b1)
    h = jnp.maximum(h, 0.0)                            # [TB, 64] == cat(h0, h1)

    # Shared body.
    body = jnp.dot(h, w2, preferred_element_type=jnp.float32) + b2
    body = jnp.maximum(body, 0.0)

    # Tails (fused weight, no activation); split into the two outputs here so
    # the wrapper never minor-dim-slices a pallas_call result.
    y = jnp.dot(body, w3, preferred_element_type=jnp.float32) + b3
    out0_ref[...] = y[:, :OUT_DIMS[0]]
    out1_ref[...] = y[:, OUT_DIMS[0]:OUT_TOTAL]


# ---------------------------------------------------------------------------
# Wrapper (jitted)
# ---------------------------------------------------------------------------
@jax.jit
def hydra_mlp_forward(x0, x1, slab):
    """x0: [B, in0], x1: [B, in1], slab: packed params. Returns (out0, out1)."""
    B = x0.shape[0]

    # Fixed-size batch tiles for large B (pipelined, shardable across cores on
    # v7x); small B rounds up to the (8,128) sublane requirement.
    tb = TB_MAX if B >= TB_MAX else _round_up(B, 8)
    Bp = _round_up(B, tb)
    if Bp != B:
        x0 = jnp.pad(x0, ((0, Bp - B), (0, 0)))
        x1 = jnp.pad(x1, ((0, Bp - B), (0, 0)))
    grid = (Bp // tb,)

    flops = 2 * Bp * (IN_TOTAL * HEAD_TOTAL + HEAD_TOTAL * BODY_HID
                      + BODY_HID * OUT_TOTAL)
    bytes_accessed = 4 * (Bp * IN_TOTAL + SLAB_ROWS * SLAB_COLS
                          + Bp * OUT_TOTAL)

    out0, out1 = pl.pallas_call(
        hydra_mlp_kernel,
        out_shape=(
            jax.ShapeDtypeStruct((Bp, OUT_DIMS[0]), jnp.float32),
            jax.ShapeDtypeStruct((Bp, OUT_DIMS[1]), jnp.float32),
        ),
        grid=grid,
        in_specs=[
            pl.BlockSpec((tb, IN_DIMS[0]), lambda i: (i, 0)),
            pl.BlockSpec((tb, IN_DIMS[1]), lambda i: (i, 0)),
            pl.BlockSpec((SLAB_ROWS, SLAB_COLS), lambda i: (0, 0)),  # resident
        ],
        out_specs=[
            pl.BlockSpec((tb, OUT_DIMS[0]), lambda i: (i, 0)),
            pl.BlockSpec((tb, OUT_DIMS[1]), lambda i: (i, 0)),
        ],
        compiler_params=pltpu.CompilerParams(
            dimension_semantics=("parallel",)),
        cost_estimate=pl.CostEstimate(
            flops=flops, transcendentals=0, bytes_accessed=bytes_accessed),
    )(x0, x1, slab)

    if Bp != B:   # major-dim (row) slice only; elided when Bp == B
        out0 = out0[:B]
        out1 = out1[:B]
    return out0, out1


# ---------------------------------------------------------------------------
# Parameter init (xavier_uniform_-like), slab packing, and pure-JAX reference
# ---------------------------------------------------------------------------
def _xavier_uniform(key, fan_in, fan_out):
    limit = (6.0 / (fan_in + fan_out)) ** 0.5
    return jax.random.uniform(
        key, (fan_in, fan_out), minval=-limit, maxval=limit, dtype=jnp.float32
    )


def make_params(key):
    keys = jax.random.split(key, 5)
    return {
        # heads
        "h0w": _xavier_uniform(keys[0], IN_DIMS[0], HEAD_HID[0]),
        "h0b": jnp.zeros((HEAD_HID[0],), jnp.float32),
        "h1w": _xavier_uniform(keys[1], IN_DIMS[1], HEAD_HID[1]),
        "h1b": jnp.zeros((HEAD_HID[1],), jnp.float32),
        # shared body
        "bw": _xavier_uniform(keys[2], HEAD_TOTAL, BODY_HID),
        "bb": jnp.zeros((BODY_HID,), jnp.float32),
        # tails
        "t0w": _xavier_uniform(keys[3], BODY_HID, OUT_DIMS[0]),
        "t0b": jnp.zeros((OUT_DIMS[0],), jnp.float32),
        "t1w": _xavier_uniform(keys[4], BODY_HID, OUT_DIMS[1]),
        "t1b": jnp.zeros((OUT_DIMS[1],), jnp.float32),
    }


def pack_params(p):
    """Pack all weights/biases into one [SLAB_ROWS, SLAB_COLS] f32 slab.

    Head weights are placed on disjoint column ranges (block-diagonal split
    into two row-aligned blocks); tails are column-concatenated.  All section
    row offsets are multiples of 8 so in-kernel slices are free views.
    Built once, outside the step loop.
    """
    slab = jnp.zeros((SLAB_ROWS, SLAB_COLS), jnp.float32)
    # heads + head biases
    slab = slab.at[_R_W1A:_R_W1A + IN_DIMS[0], 0:HEAD_HID[0]].set(p["h0w"])
    slab = slab.at[_R_W1B:_R_W1B + IN_DIMS[1], HEAD_HID[0]:HEAD_TOTAL].set(p["h1w"])
    slab = slab.at[_R_B1, 0:HEAD_HID[0]].set(p["h0b"])
    slab = slab.at[_R_B1, HEAD_HID[0]:HEAD_TOTAL].set(p["h1b"])
    # body
    slab = slab.at[_R_W2:_R_W2 + HEAD_TOTAL, :BODY_HID].set(p["bw"])
    slab = slab.at[_R_B2, :BODY_HID].set(p["bb"])
    # tails (column-concatenated)
    slab = slab.at[_R_W3:_R_W3 + BODY_HID, 0:OUT_DIMS[0]].set(p["t0w"])
    slab = slab.at[_R_W3:_R_W3 + BODY_HID, OUT_DIMS[0]:OUT_TOTAL].set(p["t1w"])
    slab = slab.at[_R_B3, 0:OUT_DIMS[0]].set(p["t0b"])
    slab = slab.at[_R_B3, OUT_DIMS[0]:OUT_TOTAL].set(p["t1b"])
    return slab


def reference_forward(xs, p):
    """Pure-JAX reference mirroring the PyTorch forward exactly."""
    h0 = jnp.maximum(xs[0] @ p["h0w"] + p["h0b"], 0.0)
    h1 = jnp.maximum(xs[1] @ p["h1w"] + p["h1b"], 0.0)
    head_cat = jnp.concatenate([h0, h1], axis=-1)
    body = jnp.maximum(head_cat @ p["bw"] + p["bb"], 0.0)
    return [body @ p["t0w"] + p["t0b"], body @ p["t1w"] + p["t1b"]]


# TODO(synk): training_step (loss/backward/Adam/StepLR/grad-clip) is out of
# scope for a forward-pass kernel and is not implemented here.

if __name__ == "__main__":
    key = jax.random.PRNGKey(0)
    kx0, kx1, kp = jax.random.split(key, 3)

    params = make_params(kp)
    slab = jax.block_until_ready(pack_params(params))   # packed once

    # Small demo batch + a non-multiple-of-8 batch to exercise the pad path.
    for b in (BATCH, 20):
        x0 = jax.random.normal(kx0, (b, IN_DIMS[0]), dtype=jnp.float32)
        x1 = jax.random.normal(kx1, (b, IN_DIMS[1]), dtype=jnp.float32)

        out0, out1 = hydra_mlp_forward(x0, x1, slab)
        out0 = jax.block_until_ready(out0)
        out1 = jax.block_until_ready(out1)

        refs = reference_forward([x0, x1], params)
        for o, r in zip([out0, out1], refs):
            assert o.shape == r.shape, (o.shape, r.shape)
            assert jnp.allclose(o, r, atol=1e-5, rtol=1e-5), (o, r)

    print("KERNEL_OK")
</pallas_src>

<mosaic_0001>
module attributes {stable_mosaic.version = 11 : i64} {
  func.func @hydra_mlp_kernel(%arg0: i32, %arg1: memref<8x4xf32, #tpu.memory_space<vmem>>, %arg2: memref<8x6xf32, #tpu.memory_space<vmem>>, %arg3: memref<168x64xf32, #tpu.memory_space<vmem>>, %arg4: memref<8x3xf32, #tpu.memory_space<vmem>>, %arg5: memref<8x5xf32, #tpu.memory_space<vmem>>) attributes {dimension_semantics = [#tpu.dimension_semantics<parallel>], iteration_bounds = array<i64: 1>, scalar_prefetch = 0 : i64, scratch_operands = 0 : i64, tpu.core_type = #tpu.core_type<tc>, window_params = [{transform_indices = @transform_0, window_bounds = array<i64: 8, 4>}, {transform_indices = @transform_1, window_bounds = array<i64: 8, 6>}, {pipeline_mode = #tpu.pipeline_mode<synchronous>, transform_indices = @transform_2, window_bounds = array<i64: 168, 64>}, {transform_indices = @transform_3, window_bounds = array<i64: 8, 3>}, {transform_indices = @transform_4, window_bounds = array<i64: 8, 5>}]} {
    %c0 = arith.constant 0 : index
    %c0_0 = arith.constant 0 : index
    %0 = vector.load %arg1[%c0, %c0_0] : memref<8x4xf32, #tpu.memory_space<vmem>>, vector<8x4xf32>
    %c0_1 = arith.constant 0 : index
    %c0_2 = arith.constant 0 : index
    %1 = vector.load %arg2[%c0_1, %c0_2] : memref<8x6xf32, #tpu.memory_space<vmem>>, vector<8x6xf32>
    %c0_3 = arith.constant 0 : index
    %c0_4 = arith.constant 0 : index
    %2 = vector.load %arg3[%c0_3, %c0_4] : memref<168x64xf32, #tpu.memory_space<vmem>>, vector<4x64xf32>
    %c8 = arith.constant 8 : index
    %c0_5 = arith.constant 0 : index
    %3 = vector.load %arg3[%c8, %c0_5] : memref<168x64xf32, #tpu.memory_space<vmem>>, vector<6x64xf32>
    %c16 = arith.constant 16 : index
    %c0_6 = arith.constant 0 : index
    %4 = vector.load %arg3[%c16, %c0_6] : memref<168x64xf32, #tpu.memory_space<vmem>>, vector<1x64xf32>
    %c24 = arith.constant 24 : index
    %c0_7 = arith.constant 0 : index
    %5 = vector.load %arg3[%c24, %c0_7] : memref<168x64xf32, #tpu.memory_space<vmem>>, vector<64x64xf32>
    %c88 = arith.constant 88 : index
    %c0_8 = arith.constant 0 : index
    %6 = vector.load %arg3[%c88, %c0_8] : memref<168x64xf32, #tpu.memory_space<vmem>>, vector<1x64xf32>
    %c96 = arith.constant 96 : index
    %c0_9 = arith.constant 0 : index
    %7 = vector.load %arg3[%c96, %c0_9] : memref<168x64xf32, #tpu.memory_space<vmem>>, vector<64x8xf32>
    %c160 = arith.constant 160 : index
    %c0_10 = arith.constant 0 : index
    %8 = vector.load %arg3[%c160, %c0_10] : memref<168x64xf32, #tpu.memory_space<vmem>>, vector<1x8xf32>
    %cst = arith.constant dense<0.000000e+00> : vector<8x64xf32>
    %9 = tpu.matmul %0, %2, %cst {dimension_numbers = #tpu.dot_dimension_numbers<[1], [0], [0], [1], [0, 0, 1, 1], [], []>} : vector<8x4xf32>, vector<4x64xf32>, vector<8x64xf32> -> vector<8x64xf32>
    %cst_11 = arith.constant dense<0.000000e+00> : vector<8x64xf32>
    %10 = tpu.matmul %1, %3, %cst_11 {dimension_numbers = #tpu.dot_dimension_numbers<[1], [0], [0], [1], [0, 0, 1, 1], [], []>} : vector<8x6xf32>, vector<6x64xf32>, vector<8x64xf32> -> vector<8x64xf32>
    %11 = arith.addf %9, %10 : vector<8x64xf32>
    %12 = vector.broadcast %4 : vector<1x64xf32> to vector<8x64xf32>
    %13 = arith.addf %11, %12 : vector<8x64xf32>
    %cst_12 = arith.constant 0.000000e+00 : f32
    %14 = vector.broadcast %cst_12 : f32 to vector<8x64xf32>
    %15 = arith.maximumf %13, %14 : vector<8x64xf32>
    %cst_13 = arith.constant dense<0.000000e+00> : vector<8x64xf32>
    %16 = tpu.matmul %15, %5, %cst_13 {dimension_numbers = #tpu.dot_dimension_numbers<[1], [0], [0], [1], [0, 0, 1, 1], [], []>} : vector<8x64xf32>, vector<64x64xf32>, vector<8x64xf32> -> vector<8x64xf32>
    %17 = vector.broadcast %6 : vector<1x64xf32> to vector<8x64xf32>
    %18 = arith.addf %16, %17 : vector<8x64xf32>
    %cst_14 = arith.constant 0.000000e+00 : f32
    %19 = vector.broadcast %cst_14 : f32 to vector<8x64xf32>
    %20 = arith.maximumf %18, %19 : vector<8x64xf32>
    %cst_15 = arith.constant dense<0.000000e+00> : vector<8x8xf32>
    %21 = tpu.matmul %20, %7, %cst_15 {dimension_numbers = #tpu.dot_dimension_numbers<[1], [0], [0], [1], [0, 0, 1, 1], [], []>} : vector<8x64xf32>, vector<64x8xf32>, vector<8x8xf32> -> vector<8x8xf32>
    %22 = vector.broadcast %8 : vector<1x8xf32> to vector<8x8xf32>
    %23 = arith.addf %21, %22 : vector<8x8xf32>
    %24 = vector.extract_strided_slice %23 {offsets = [0, 0], sizes = [8, 3], strides = [1, 1]} : vector<8x8xf32> to vector<8x3xf32>
    %c0_16 = arith.constant 0 : index
    %c0_17 = arith.constant 0 : index
    %25 = vector.load %arg4[%c0_16, %c0_17] : memref<8x3xf32, #tpu.memory_space<vmem>>, vector<8x3xf32>
    tpu.vector_store %arg4[%c0_16, %c0_17], %24 {strides = array<i32>} : memref<8x3xf32, #tpu.memory_space<vmem>>, vector<8x3xf32>,
    %26 = vector.extract_strided_slice %23 {offsets = [0, 3], sizes = [8, 5], strides = [1, 1]} : vector<8x8xf32> to vector<8x5xf32>
    %c0_18 = arith.constant 0 : index
    %c0_19 = arith.constant 0 : index
    %27 = vector.load %arg5[%c0_18, %c0_19] : memref<8x5xf32, #tpu.memory_space<vmem>>, vector<8x5xf32>
    tpu.vector_store %arg5[%c0_18, %c0_19], %26 {strides = array<i32>} : memref<8x5xf32, #tpu.memory_space<vmem>>, vector<8x5xf32>,
    return
  }
  func.func @transform_0(%arg0: i32) -> (i32, i32) {
    %c0_i32 = arith.constant 0 : i32
    %c0_i32_0 = arith.constant 0 : i32
    return %arg0, %c0_i32 : i32, i32
  }
  func.func @transform_1(%arg0: i32) -> (i32, i32) {
    %c0_i32 = arith.constant 0 : i32
    %c0_i32_0 = arith.constant 0 : i32
    return %arg0, %c0_i32 : i32, i32
  }
  func.func @transform_2(%arg0: i32) -> (i32, i32) {
    %c0_i32 = arith.constant 0 : i32
    %c0_i32_0 = arith.constant 0 : i32
    %c0_i32_1 = arith.constant 0 : i32
    return %c0_i32, %c0_i32_0 : i32, i32
  }
  func.func @transform_3(%arg0: i32) -> (i32, i32) {
    %c0_i32 = arith.constant 0 : i32
    %c0_i32_0 = arith.constant 0 : i32
    return %arg0, %c0_i32 : i32, i32
  }
  func.func @transform_4(%arg0: i32) -> (i32, i32) {
    %c0_i32 = arith.constant 0 : i32
    %c0_i32_0 = arith.constant 0 : i32
    return %arg0, %c0_i32 : i32, i32
  }
}

</mosaic_0001>

<bundles_post_ra>
// kernel: hydra_mlp_forward.1
= control target key start
LH: loop header
LB: loop body
LE: loop exit
PB: predicated region body
PF: predicated region fallthrough
CT: control target
= control target key end

     0   :  { %vm44_vm0 = vcmask 1045504   ;;  %vm72_vm1 = vcmask 1043456   ;;  %vm40_vm2 = vcmask 48128   ;;  %vm68_vm3 = vcmask 31744   ;;  %s316_s0 = inlined_call_operand.vmem [shape: f32[8,4], index: 0, kind: input, shape index: {}]   ;;  %s317_s1 = inlined_call_operand.vmem [shape: f32[8,6], index: 1, kind: input, shape index: {}]   ;;  %s318_s2 = inlined_call_operand.vmem [shape: f32[168,64], index: 2, kind: input, shape index: {}]   ;;  %s319_s3 = inlined_call_operand.vmem [shape: f32[8,3], index: 3, kind: output, shape index: {0}]   ;;  %s320_s4 = inlined_call_operand.hbm [shape: f32[8,5], index: 4, kind: output, shape index: {1}]  }
   0x1   :  { %v20_v0 = vld [vmem:[%s318_s2 + $0x8] sm:$0x3f]  ;;  %v19_v1 = vld [vmem:[%s318_s2] sm:$0xf]  ;;  %v29_v4 = vld [vmem:[%s318_s2 + $0x50] sm:$0xff] }
   0x2   :  { %177 = vmatpush.msk.msra.mxu0 %vm44_vm0, %v20_v0  ;;  %179 = vmatpush.msk.msra.mxu1 %vm72_vm1, %v19_v1  ;;  %v18_v2 = vld [vmem:[%s317_s1] sm:$0xff]  ;;  %v28_v5 = vld [vmem:[%s318_s2 + $0x48] sm:$0xff] }
   0x3   :  { %v17_v3 = vld [vmem:[%s316_s0] sm:$0xff]  ;;  %178 = vmatmul.msk.f32.vlgmr.msra.gmra.mxu0 %vm40_vm2, %v18_v2  ;;  %112 = vmatpush.msra.mxu2 %v29_v4 }
   0x4   :  { %180 = vmatmul.msk.f32.vlgmr.msra.gmra.mxu1 %vm68_vm3, %v17_v3  ;;  %v27_v6 = vld [vmem:[%s318_s2 + $0x40] sm:$0xff] }
   0x5   :  { %10 = vsyncpa [#allocation3], 0  ;;  %113 = vmatpush.msra.mxu2 %v28_v5  ;;  %v26_v7 = vld [vmem:[%s318_s2 + $0x38] sm:$0xff]  ;;  %v25_v8 = vld [vmem:[%s318_s2 + $0x30] sm:$0xff]  ;;  %vm100_vm4 = vcmask 523264   ;;  %vm149_vm5 = vcmask 23552  }
   0x6   :  { %v24_v9 = vld [vmem:[%s318_s2 + $0x28] sm:$0xff]  ;;  %v23_v10 = vld [vmem:[%s318_s2 + $0x20] sm:$0xff]  ;;  %v22_v11 = vld [vmem:[%s318_s2 + $0x18] sm:$0xff]  ;;  %s214_s7 = smov 125   ;;  %s215_s8 = smov [#allocation2]   ;;  %vm155_vm6 = vcmask 39936  }
   0x7   :  { %114 = vmatpush.msra.mxu2 %v27_v6  ;;  %v38_v12 = vld [vmem:[%s318_s2 + $0x98] sm:$0xff]  ;;  %v37_v13 = vld [vmem:[%s318_s2 + $0x90] sm:$0xff]  ;;  %v36_v14 = vld [vmem:[%s318_s2 + $0x88] sm:$0xff]  ;;  %s164_s9 = sshll.u32 %s215_s8, 4  ;;  %s166_s12 = sshll.u32 %s320_s4, 4  ;;  %s165_s9 = int_to_ptr.vmem [resolvable:$true] %s164_s9  ;;  %s167_s12 = int_to_ptr.hbm [resolvable:$true] %s166_s12 }
   0x8   :  { %137 = vmatpush.msra.mxu3 %v38_v12  ;;  %v35_v15 = vld [vmem:[%s318_s2 + $0x80] sm:$0xff]  ;;  %v34_v16 = vld [vmem:[%s318_s2 + $0x78] sm:$0xff]  ;;  %v185_v17 = vld [vmem:[%s318_s2 + $0x10] ss:$0 sm:$0xff] }
   0x9   :  { %115 = vmatpush.msra.mxu2 %v26_v7  ;;  %v33_v23 = vld [vmem:[%s318_s2 + $0x70] sm:$0xff]  ;;  %v32_v24 = vld [vmem:[%s318_s2 + $0x68] sm:$0xff]  ;;  %v31_v25 = vld [vmem:[%s318_s2 + $0x60] sm:$0xff] }
   0xa   :  { %138 = vmatpush.msra.mxu3 %v37_v13  ;;  %v186_v26 = vld [vmem:[%s318_s2 + $0x58] ss:$0 sm:$0xff]  ;;  %v187_v30 = vld [vmem:[%s318_s2 + $0xa0] ss:$0 sm:$0xff] }
   0xb   :  { %116 = vmatpush.msra.mxu2 %v25_v8 }
   0xc   :  { %139 = vmatpush.msra.mxu3 %v36_v14 }
   0xd   :  { %117 = vmatpush.msra.mxu2 %v24_v9 }
   0xe   :  { %140 = vmatpush.msra.mxu3 %v35_v15 }
   0xf   :  { %118 = vmatpush.msra.mxu2 %v23_v10 }
  0x10   :  { %141 = vmatpush.msra.mxu3 %v34_v16 }
  0x11   :  { %119 = vmatpush.msra.mxu2 %v22_v11 }
  0x12   :  { %142 = vmatpush.msra.mxu3 %v33_v23 }
  0x14   :  { %143 = vmatpush.msra.mxu3 %v32_v24 }
  0x16   :  { %144 = vmatpush.msra.mxu3 %v31_v25 }
  0x80   :  { %v65_v18 = vpop.f32.mrf.mxu0 }
  0x81   :  { %v93_v19 = vpop.f32.mrf.mxu1 }
  0x82   :  { %v94_v20 = vadd.f32 %v93_v19, %v65_v18 }
  0x84   :  { %v97_v21 = vadd.f32 %v185_v17, %v94_v20 }
  0x86   :  { %v98_v22 = vmax.f32 %v97_v21, 0.0 }
  0x88   :  { %181 = vmatmul.msk.f32.vlgmr.msra.gmra.mxu2 %vm100_vm4, %v98_v22 }
 0x10b   :  { %v121_v27 = vpop.f32.mrf.mxu2 }
 0x10c   :  { %v122_v28 = vadd.f32 %v186_v26, %v121_v27 }
 0x10e   :  { %v124_v29 = vmax.f32 %v122_v28, 0.0 }
 0x110   :  { %182 = vmatmul.msk.f32.vlgmr.msra.gmra.mxu3 %vm100_vm4, %v124_v29 }
 0x193   :  { %v146_v31 = vpop.f32.mrf.mxu3 }
 0x194   :  { %v147_v32 = vadd.f32 %v187_v30, %v146_v31 }
 0x196   :  { %150 = vst.msk [vmem:[%s319_s3] sm:$0xff] %vm149_vm5, %v147_v32  ;;  %152 = vrot.lane.b32.xlu0 %v147_v32, %s214_s7 }
 0x208   :  { %v153_v33 = vpop.permute.xlu0 %152 }
 0x209   :  { %156 = vst.msk [vmem:[#allocation2] sm:$0xff] %vm155_vm6, %v153_v33 }
 0x20a   :  { %169 = dma.vmem_to_hbm [thread:$0]  %s165_s9, 128, %s167_s12, [#allocation3]  }
 0x20b   :  { %212 = dma.done.wait [#allocation3], 128  }
 0x20c   :  { %213 = vsyncadd [#allocation3], 4294967168 }
 0x20d   :  { %176 = vsyncpa [#allocation3], 1 }

</bundles_post_ra>
